<compile_context>
chip_gen: v5e
topology: v5e:2x2
jax: 0.10.0
libtpu: 0.0.40
codegen_flags: <defaults>
</compile_context>

<pallas_src>
import functools

import jax
import jax.numpy as jnp
from jax.experimental import pallas as pl
from jax.experimental.pallas import tpu as pltpu


def _round_up(n: int, m: int) -> int:
    return ((n + m - 1) // m) * m


def mlp_kernel(x_ref, w1_ref, b1_ref, w2_ref, b2_ref, o_ref, *, out_dim):
    # Cast x to the compute dtype in-kernel (VPU work hidden under the MXU).
    x = x_ref[...].astype(w1_ref.dtype)
    # Hidden layer: Linear (MXU, bf16 in / f32 accumulate) -> bias -> tanh (f32, EUP).
    h = jnp.tanh(
        jnp.dot(x, w1_ref[...], preferred_element_type=jnp.float32) + b1_ref[...]
    )
    # Output layer: Linear. N is lane-padded in VMEM; store only the real lanes.
    logits = (
        jnp.dot(h.astype(w2_ref.dtype), w2_ref[...],
                preferred_element_type=jnp.float32)
        + b2_ref[...]
    )
    o_ref[...] = logits[:, :out_dim].astype(o_ref.dtype)


def prepare_params(w1, b1, w2, b2, *, compute_dtype=jnp.bfloat16):
    """Pad/cast weights once (hoisted out of the per-call forward path).

    w1: [F, H], b1: [H] or [1, H], w2: [H, O], b2: [O] or [1, O].
    H/O are lane-padded (zeros) for dense MXU tiles; F stays exact so the
    first matmul's K dimension matches the unpadded x stream.
    """
    F, H = w1.shape
    O = w2.shape[1]
    # 256-multiples only when the real dim can use the deeper v6e/v7x MXU.
    Hp = _round_up(H, 256) if H >= 256 else _round_up(H, 128)
    Op = _round_up(O, 256) if O >= 256 else _round_up(O, 128)
    cdt = jnp.dtype(compute_dtype)

    w1p = jnp.zeros((F, Hp), cdt).at[:, :H].set(w1.astype(cdt))
    b1p = jnp.zeros((1, Hp), jnp.float32).at[:, :H].set(
        b1.astype(jnp.float32).reshape(1, H))
    w2p = jnp.zeros((Hp, Op), cdt).at[:H, :O].set(w2.astype(cdt))
    b2p = jnp.zeros((1, Op), jnp.float32).at[:, :O].set(
        b2.astype(jnp.float32).reshape(1, O))
    return {"w1": w1p, "b1": b1p, "w2": w2p, "b2": b2p, "out_dim": O}


def _pick_block_b(B, F, Hp, O, requested, x_itemsize):
    bb = max(8, min(_round_up(requested, 8), _round_up(B, 8)))
    # v7x megacore: ensure the "parallel" batch axis has >= 2 grid steps when possible.
    if -(-B // bb) < 2 and B > 8:
        bb = max(8, _round_up(-(-B // 2), 8))
    # VMEM budget for streamed / temporary tiles:
    # x (double-buffered, native dtype) + h (f32) + out (double-buffered, f32).
    per_row = 2 * F * x_itemsize + Hp * 4 + 2 * O * 4
    max_bb = max(8, (12 * 1024 * 1024 // per_row) // 8 * 8)
    return min(bb, max_bb)


def nn_model_forward(x, params, *, block_b=1024):
    """x: [B, F] (f32), params from prepare_params -> [B, O] f32 logits."""
    B, F = x.shape
    w1p, b1p, w2p, b2p = params["w1"], params["b1"], params["w2"], params["b2"]
    O = params["out_dim"]
    Hp, Op = w2p.shape
    assert w1p.shape == (F, Hp)

    bb = _pick_block_b(B, F, Hp, O, block_b, x.dtype.itemsize)
    grid = (pl.cdiv(B, bb),)

    # Explicit VMEM limit (weights are double-buffered by default; tiny here).
    weight_bytes = (F * Hp + Hp * Op) * w1p.dtype.itemsize + (Hp + Op) * 4
    tile_bytes = bb * (2 * F * x.dtype.itemsize + 2 * O * 4)
    temp_bytes = bb * (Hp + Op) * 4
    vmem_limit = int(min(max(2 * (2 * weight_bytes + tile_bytes + temp_bytes),
                             32 * 1024 * 1024), 64 * 1024 * 1024))

    cost = pl.CostEstimate(
        flops=int(2 * B * (F * Hp + Hp * Op)),
        transcendentals=int(B * Hp),
        bytes_accessed=int(
            B * F * x.dtype.itemsize            # x read (native dtype)
            + weight_bytes                       # weights/biases read once
            + B * O * 4                          # logits write (real lanes only)
        ),
    )

    kernel = functools.partial(mlp_kernel, out_dim=O)

    return pl.pallas_call(
        kernel,
        out_shape=jax.ShapeDtypeStruct((B, O), jnp.float32),
        grid_spec=pl.GridSpec(
            grid=grid,
            in_specs=[
                pl.BlockSpec((bb, F), lambda i: (i, 0)),   # x tile (streamed)
                pl.BlockSpec((F, Hp), lambda i: (0, 0)),   # W1 (resident)
                pl.BlockSpec((1, Hp), lambda i: (0, 0)),   # b1 (resident)
                pl.BlockSpec((Hp, Op), lambda i: (0, 0)),  # W2 (resident)
                pl.BlockSpec((1, Op), lambda i: (0, 0)),   # b2 (resident)
            ],
            out_specs=pl.BlockSpec((bb, O), lambda i: (i, 0)),
        ),
        compiler_params=pltpu.CompilerParams(
            dimension_semantics=("parallel",),
            vmem_limit_bytes=vmem_limit,
        ),
        cost_estimate=cost,
    )(x, w1p, b1p, w2p, b2p)


def _init_linear(key, fan_in, fan_out):
    # Deterministic init mimicking torch.nn.Linear default U(-1/sqrt(fan_in), +).
    kw, kb = jax.random.split(key)
    bound = 1.0 / jnp.sqrt(fan_in)
    w = jax.random.uniform(kw, (fan_in, fan_out), jnp.float32, -bound, bound)
    b = jax.random.uniform(kb, (1, fan_out), jnp.float32, -bound, bound)
    return w, b


def _reference_bf16(x, w1, b1, w2, b2):
    # Same precision policy as the kernel: bf16 matmul inputs, f32 accumulation,
    # f32 bias add and tanh.
    h = jnp.tanh(
        jnp.dot(x.astype(jnp.bfloat16), w1.astype(jnp.bfloat16),
                preferred_element_type=jnp.float32) + b1)
    return jnp.dot(h.astype(jnp.bfloat16), w2.astype(jnp.bfloat16),
                   preferred_element_type=jnp.float32) + b2


if __name__ == "__main__":
    key = jax.random.PRNGKey(0)
    k_x, k_x2, k_l1, k_l2 = jax.random.split(key, 4)

    # Small shapes consistent with the module: n_in=(num_samples, num_features).
    batch, n_features, n_hidden, n_out = 8, 32, 64, 8

    x = jax.random.normal(k_x, (batch, n_features), jnp.float32)
    w1, b1 = _init_linear(k_l1, n_features, n_hidden)
    w2, b2 = _init_linear(k_l2, n_hidden, n_out)

    params = prepare_params(w1, b1, w2, b2)

    out = nn_model_forward(x, params)
    out = jax.block_until_ready(out)
    assert out.shape == (batch, n_out)

    ref = _reference_bf16(x, w1, b1, w2, b2)
    assert jnp.allclose(out, ref, atol=2e-3, rtol=2e-3), (
        float(jnp.max(jnp.abs(out - ref))))

    # Sanity vs. full-f32 math (loose tol for bf16 matmul inputs).
    ref_f32 = jnp.tanh(x @ w1 + b1) @ w2 + b2
    assert jnp.allclose(out, ref_f32, atol=5e-2, rtol=5e-2)

    # Exercise the cdiv grid / partial-tail masking and the multi-step
    # (megacore-shardable) batch path with a batch that is not a multiple of
    # the block size.
    batch2 = 300
    x2 = jax.random.normal(k_x2, (batch2, n_features), jnp.float32)
    out2 = jax.block_until_ready(nn_model_forward(x2, params))
    assert out2.shape == (batch2, n_out)
    ref2 = _reference_bf16(x2, w1, b1, w2, b2)
    assert jnp.allclose(out2, ref2, atol=2e-3, rtol=2e-3), (
        float(jnp.max(jnp.abs(out2 - ref2))))

    print("KERNEL_OK")
</pallas_src>

<mosaic_0001>
module attributes {stable_mosaic.version = 11 : i64} {
  func.func @mlp_kernel(%arg0: i32, %arg1: memref<8x32xf32, #tpu.memory_space<vmem>>, %arg2: memref<32x128xbf16, #tpu.memory_space<vmem>>, %arg3: memref<1x128xf32, #tpu.memory_space<vmem>>, %arg4: memref<128x128xbf16, #tpu.memory_space<vmem>>, %arg5: memref<1x128xf32, #tpu.memory_space<vmem>>, %arg6: memref<8x8xf32, #tpu.memory_space<vmem>>) attributes {dimension_semantics = [#tpu.dimension_semantics<parallel>], iteration_bounds = array<i64: 1>, scalar_prefetch = 0 : i64, scratch_operands = 0 : i64, tpu.core_type = #tpu.core_type<tc>, window_params = [{transform_indices = @transform_0, window_bounds = array<i64: 8, 32>}, {pipeline_mode = #tpu.pipeline_mode<synchronous>, transform_indices = @transform_1, window_bounds = array<i64: 32, 128>}, {pipeline_mode = #tpu.pipeline_mode<synchronous>, transform_indices = @transform_2, window_bounds = array<i64: 1, 128>}, {pipeline_mode = #tpu.pipeline_mode<synchronous>, transform_indices = @transform_3, window_bounds = array<i64: 128, 128>}, {pipeline_mode = #tpu.pipeline_mode<synchronous>, transform_indices = @transform_4, window_bounds = array<i64: 1, 128>}, {transform_indices = @transform_5, window_bounds = array<i64: 8, 8>}]} {
    %c0 = arith.constant 0 : index
    %c0_0 = arith.constant 0 : index
    %0 = vector.load %arg1[%c0, %c0_0] : memref<8x32xf32, #tpu.memory_space<vmem>>, vector<8x32xf32>
    %1 = arith.truncf %0 : vector<8x32xf32> to vector<8x32xbf16>
    %c0_1 = arith.constant 0 : index
    %c0_2 = arith.constant 0 : index
    %2 = vector.load %arg2[%c0_1, %c0_2] : memref<32x128xbf16, #tpu.memory_space<vmem>>, vector<32x128xbf16>
    %cst = arith.constant dense<0.000000e+00> : vector<8x128xf32>
    %3 = tpu.matmul %1, %2, %cst {dimension_numbers = #tpu.dot_dimension_numbers<[1], [0], [0], [1], [0, 0, 1, 1], [], []>} : vector<8x32xbf16>, vector<32x128xbf16>, vector<8x128xf32> -> vector<8x128xf32>
    %c0_3 = arith.constant 0 : index
    %c0_4 = arith.constant 0 : index
    %4 = vector.load %arg3[%c0_3, %c0_4] : memref<1x128xf32, #tpu.memory_space<vmem>>, vector<1x128xf32>
    %5 = vector.broadcast %4 : vector<1x128xf32> to vector<8x128xf32>
    %6 = arith.addf %3, %5 : vector<8x128xf32>
    %7 = math.tanh %6 : vector<8x128xf32>
    %8 = arith.truncf %7 : vector<8x128xf32> to vector<8x128xbf16>
    %c0_5 = arith.constant 0 : index
    %c0_6 = arith.constant 0 : index
    %9 = vector.load %arg4[%c0_5, %c0_6] : memref<128x128xbf16, #tpu.memory_space<vmem>>, vector<128x128xbf16>
    %cst_7 = arith.constant dense<0.000000e+00> : vector<8x128xf32>
    %10 = tpu.matmul %8, %9, %cst_7 {dimension_numbers = #tpu.dot_dimension_numbers<[1], [0], [0], [1], [0, 0, 1, 1], [], []>} : vector<8x128xbf16>, vector<128x128xbf16>, vector<8x128xf32> -> vector<8x128xf32>
    %c0_8 = arith.constant 0 : index
    %c0_9 = arith.constant 0 : index
    %11 = vector.load %arg5[%c0_8, %c0_9] : memref<1x128xf32, #tpu.memory_space<vmem>>, vector<1x128xf32>
    %12 = vector.broadcast %11 : vector<1x128xf32> to vector<8x128xf32>
    %13 = arith.addf %10, %12 : vector<8x128xf32>
    %14 = vector.extract_strided_slice %13 {offsets = [0, 0], sizes = [8, 8], strides = [1, 1]} : vector<8x128xf32> to vector<8x8xf32>
    %c0_10 = arith.constant 0 : index
    %c0_11 = arith.constant 0 : index
    %15 = vector.load %arg6[%c0_10, %c0_11] : memref<8x8xf32, #tpu.memory_space<vmem>>, vector<8x8xf32>
    tpu.vector_store %arg6[%c0_10, %c0_11], %14 {strides = array<i32>} : memref<8x8xf32, #tpu.memory_space<vmem>>, vector<8x8xf32>,
    return
  }
  func.func @transform_0(%arg0: i32) -> (i32, i32) {
    %c0_i32 = arith.constant 0 : i32
    %c0_i32_0 = arith.constant 0 : i32
    return %arg0, %c0_i32 : i32, i32
  }
  func.func @transform_1(%arg0: i32) -> (i32, i32) {
    %c0_i32 = arith.constant 0 : i32
    %c0_i32_0 = arith.constant 0 : i32
    %c0_i32_1 = arith.constant 0 : i32
    return %c0_i32, %c0_i32_0 : i32, i32
  }
  func.func @transform_2(%arg0: i32) -> (i32, i32) {
    %c0_i32 = arith.constant 0 : i32
    %c0_i32_0 = arith.constant 0 : i32
    %c0_i32_1 = arith.constant 0 : i32
    return %c0_i32, %c0_i32_0 : i32, i32
  }
  func.func @transform_3(%arg0: i32) -> (i32, i32) {
    %c0_i32 = arith.constant 0 : i32
    %c0_i32_0 = arith.constant 0 : i32
    %c0_i32_1 = arith.constant 0 : i32
    return %c0_i32, %c0_i32_0 : i32, i32
  }
  func.func @transform_4(%arg0: i32) -> (i32, i32) {
    %c0_i32 = arith.constant 0 : i32
    %c0_i32_0 = arith.constant 0 : i32
    %c0_i32_1 = arith.constant 0 : i32
    return %c0_i32, %c0_i32_0 : i32, i32
  }
  func.func @transform_5(%arg0: i32) -> (i32, i32) {
    %c0_i32 = arith.constant 0 : i32
    %c0_i32_0 = arith.constant 0 : i32
    return %arg0, %c0_i32 : i32, i32
  }
}

</mosaic_0001>

<bundles_post_ra>
// kernel: tpu_custom_call.1
= control target key start
LH: loop header
LB: loop body
LE: loop exit
PB: predicated region body
PF: predicated region fallthrough
CT: control target
= control target key end

     0   :  { %10 = vsyncpa [#allocation3], 0  ;;  %s426_s0 = inlined_call_operand.hbm [shape: f32[8,32], index: 0, kind: input, shape index: {}]   ;;  %s427_s1 = inlined_call_operand.hbm [shape: bf16[32,128], index: 1, kind: input, shape index: {}]   ;;  %s428_s2 = inlined_call_operand.vmem [shape: f32[1,128], index: 2, kind: input, shape index: {}]   ;;  %s429_s3 = inlined_call_operand.hbm [shape: bf16[128,128], index: 3, kind: input, shape index: {}]   ;;  %s430_s4 = inlined_call_operand.vmem [shape: f32[1,128], index: 4, kind: input, shape index: {}]   ;;  %s431_s5 = inlined_call_operand.hbm [shape: f32[8,8], index: 5, kind: output, shape index: {}]  }
   0x1   :  { %11 = vsyncpa [#allocation6], 0  ;;  %s28_s20 = sshll.u32 %s427_s1, 4  ;;  %s29_s20 = int_to_ptr.hbm [resolvable:$true] %s28_s20 }
   0x2   :  { %12 = vsyncpa [#allocation4], 0  ;;  %s372_s21 = smov [#allocation5]   ;;  %s18_s25 = sshll.u32 %s426_s0, 4  ;;  %s19_s25 = int_to_ptr.hbm [resolvable:$true] %s18_s25 }
   0x3   :  { %s30_s22 = sshll.u32 %s372_s21, 4  ;;  %s373_s26 = smov 64   ;;  %s31_s22 = int_to_ptr.vmem [resolvable:$true] %s30_s22 }
   0x4   :  { %s374_s27 = smov 4   ;;  %s375_s28 = smov [#allocation2]  }
   0x5   :  { %36 = dma.hbm_to_vmem [thread:$0]  %s29_s20, 256, %s31_s22, [#allocation6], %s373_s26, %s373_s26, %s374_s27  }
   0x6   :  { %s20_s29 = sshll.u32 %s375_s28, 4  ;;  %s43_s7 = sshll.u32 %s429_s3, 4  ;;  %s21_s29 = int_to_ptr.vmem [resolvable:$true] %s20_s29  ;;  %s44_s7 = int_to_ptr.hbm [resolvable:$true] %s43_s7 }
   0x7   :  { %23 = dma.hbm_to_vmem [thread:$0]  %s19_s25, 128, %s21_s29, [#allocation3]  }
   0x8   :  { %s376_s1 = smov [#allocation7]  }
   0x9   :  { %s45_s8 = sshll.u32 %s376_s1, 4  ;;  %s46_s8 = int_to_ptr.vmem [resolvable:$true] %s45_s8 }
   0xa   :  { %51 = dma.hbm_to_vmem [thread:$0]  %s44_s7, 1024, %s46_s8, [#allocation6], %s373_s26, %s373_s26, %s374_s27  }
   0xb   :  { %366 = dma.done.wait [#allocation3], 128  }
   0xc   :  { %367 = vsyncadd [#allocation3], 4294967168 }
   0xd   :  { %368 = dma.done.wait [#allocation6], 1280  }
   0xe   :  { %369 = vsyncadd [#allocation6], 4294966016  ;;  %v251_v0 = vld [vmem:[#allocation5 + $0x8] sm:$0xff]  ;;  %v250_v2 = vld [vmem:[#allocation5] sm:$0xff]  ;;  %vm89_vm0 = vcmask 261120   ;;  %s377_s11 = smov [#allocation8]  }
   0xf   :  { %v259_v1 = vld [vmem:[#allocation7 + $0x38] sm:$0xff]  ;;  %99 = vmatpush.bf16.msra.mxu0 %v251_v0  ;;  %v67_v3 = vld [vmem:[#allocation2] sm:$0xff]  ;;  %v258_v4 = vld [vmem:[#allocation7 + $0x30] sm:$0xff]  ;;  %s196_s12 = sshll.u32 %s377_s11, 4  ;;  %s198_s15 = sshll.u32 %s431_s5, 4  ;;  %vm189_vm1 = vcmask 64512   ;;  %s197_s12 = int_to_ptr.vmem [resolvable:$true] %s196_s12  ;;  %s199_s15 = int_to_ptr.hbm [resolvable:$true] %s198_s15 }
  0x10   :  { %176 = vmatpush.bf16.msra.mxu1 %v259_v1  ;;  %v68_v5 = vpack.c.bf16 %v67_v3, %v67_v3  ;;  %v257_v6 = vld [vmem:[#allocation7 + $0x28] sm:$0xff]  ;;  %v256_v7 = vld [vmem:[#allocation7 + $0x20] sm:$0xff]  ;;  %v255_v8 = vld [vmem:[#allocation7 + $0x18] sm:$0xff] }
  0x11   :  { %v254_v9 = vld [vmem:[#allocation7 + $0x10] sm:$0xff]  ;;  %v253_v10 = vld [vmem:[#allocation7 + $0x8] sm:$0xff]  ;;  %v252_v11 = vld [vmem:[#allocation7] sm:$0xff] }
  0x12   :  { %v266_v12 = vld [vmem:[%s428_s2] ss:$0 sm:$0xff] }
  0x13   :  { %100 = vmatpush.bf16.msra.mxu0 %v250_v2  ;;  %v267_v18 = vld [vmem:[%s430_s4] ss:$0 sm:$0xff] }
  0x14   :  { %177 = vmatpush.bf16.msra.mxu1 %v258_v4 }
  0x16   :  { %217 = vmatmul.msk.bf16.vlgmr.msra.gmra.mxu0 %vm89_vm0, %v68_v5 }
  0x18   :  { %178 = vmatpush.bf16.msra.mxu1 %v257_v6 }
  0x1c   :  { %179 = vmatpush.bf16.msra.mxu1 %v256_v7 }
  0x20   :  { %180 = vmatpush.bf16.msra.mxu1 %v255_v8 }
  0x24   :  { %181 = vmatpush.bf16.msra.mxu1 %v254_v9 }
  0x28   :  { %182 = vmatpush.bf16.msra.mxu1 %v253_v10 }
  0x2c   :  { %183 = vmatpush.bf16.msra.mxu1 %v252_v11 }
  0x93   :  { %v102_v13 = vpop.f32.mrf.mxu0 }
  0x94   :  { %v103_v14 = vadd.f32 %v266_v12, %v102_v13 }
  0x96   :  { %268 = vtanh.f32 %v103_v14 }
  0x9b   :  { %v104_v15 = vpop.f32.mrf.mxu0 }
  0x9c   :  { %v269_v16 = vpop.eup %268 }
  0x9d   :  { %v107_v17 = vpack.c.bf16 %v269_v16, %v269_v16 }
  0x9f   :  { %184 = vmatmul.bf16.vlgmr.msra.gmra.mxu1 %v107_v17 }
 0x11c   :  { %v185_v19 = vpop.f32.mrf.mxu1 }
 0x11d   :  { %v186_v20 = vadd.f32 %v267_v18, %v185_v19 }
 0x11f   :  { %190 = vst.msk [vmem:[#allocation8] sm:$0xff] %vm189_vm1, %v186_v20 }
 0x120   :  { %201 = dma.vmem_to_hbm [thread:$0]  %s197_s12, 128, %s199_s15, [#allocation4]  }
 0x124   :  { %v187_v21 = vpop.f32.mrf.mxu1 }
 0x125   :  { %370 = dma.done.wait [#allocation4], 128  }
 0x126   :  { %371 = vsyncadd [#allocation4], 4294967168 }
 0x127   :  { %206 = vsyncpa [#allocation3], 1 }
 0x128   :  { %207 = vsyncpa [#allocation6], 1 }
 0x129   :  { %208 = vsyncpa [#allocation4], 1 }

</bundles_post_ra>
